<compile_context>
chip_gen: v7x
topology: tpu7x:2x2x1
jax: 0.10.0
libtpu: 0.0.40
codegen_flags: <defaults>
</compile_context>

<pallas_src>
import functools

import jax
import jax.numpy as jnp
from jax.experimental import pallas as pl
from jax.experimental.pallas import tpu as pltpu


# --------------------------------- kernel ---------------------------------- #

def _pos_enc_kernel(x_ref, pe_ref, o_ref, *, batch):
    """x_ref/o_ref: (tL, B*D); pe_ref: (tL, D).

    pe is replicated `batch` times along the lane axis so the add is a dense VPU
    op with fully packed sublanes and an unmasked store.
    """
    pe = pe_ref[...]
    if batch > 1:
        pe = jnp.concatenate([pe] * batch, axis=-1)   # (tL, B*D): lane-wise vreg copies
    o_ref[...] = x_ref[...] + pe
    # TODO(synk): nn.Dropout(p=0.1) is identity in eval mode; training-mode
    # stochastic masking (pltpu.prng_seed + pltpu.prng_random_bits) is not applied.


# -------------------------------- tiling ------------------------------------ #

_TARGET_BLOCK_BYTES = 8 * 1024 * 1024     # ~8 MiB x-block: near HBM roofline on all gens
_VMEM_LIMIT_CAP = 48 * 1024 * 1024        # stays safe on v7x (64 MiB physical VMEM)


def _pick_tile_l(L, row_bytes):
    """Rows (of B*D elements each) per block: multiple of 8, ~_TARGET_BLOCK_BYTES."""
    tl = max(1, _TARGET_BLOCK_BYTES // max(row_bytes, 1))
    if tl >= L:
        return L                            # single block == full dim (always legal)
    tl = max(8, (tl // 8) * 8)              # sublane-aligned
    return L if tl >= L else tl
    # TODO(synk): rows larger than ~6 MiB (huge B*D) would need a second grid axis
    # over the lane dimension to stay inside VMEM; not needed for this module's
    # typical shapes.


# -------------------------------- wrapper ----------------------------------- #

def learnable_positional_encoding_forward(x, pe, *, min_pallas_bytes=1 << 20):
    """x: (L, B, D) [seq, batch, embed], pe: (max_len, 1, D) -> (L, B, D)."""
    L, B, D = x.shape
    max_len = pe.shape[0]
    if L > max_len:
        raise ValueError(f"sequence length {L} exceeds max_len {max_len}")

    out_dtype = jnp.promote_types(x.dtype, pe.dtype)
    pe_l = pe[:L, 0, :].astype(out_dtype)          # (L, D); cast once (usually a no-op)

    # Tiny problems: let XLA fuse the add; kernel-launch / prologue cost dominates.
    if x.size * x.dtype.itemsize < min_pallas_bytes:
        return (x + pe_l[:, None, :]).astype(out_dtype)

    BD = B * D
    x2 = x.reshape(L, BD)                          # free contiguous view: lane-dense layout
    tL = _pick_tile_l(L, BD * x.dtype.itemsize)
    grid = (pl.cdiv(L, tL),)

    # Double-buffered footprint: 2 * (x block + out block + pe block) + slack.
    out_itemsize = jnp.dtype(out_dtype).itemsize
    footprint = 2 * (tL * BD * x.dtype.itemsize
                     + tL * BD * out_itemsize
                     + tL * D * out_itemsize) + (2 << 20)
    vmem_limit = int(min(_VMEM_LIMIT_CAP, max(32 * 1024 * 1024, footprint)))

    out2 = pl.pallas_call(
        functools.partial(_pos_enc_kernel, batch=B),
        out_shape=jax.ShapeDtypeStruct((L, BD), out_dtype),
        grid=grid,
        in_specs=[
            pl.BlockSpec((tL, BD), lambda i: (i, 0)),
            pl.BlockSpec((tL, D), lambda i: (i, 0)),
        ],
        out_specs=pl.BlockSpec((tL, BD), lambda i: (i, 0)),
        compiler_params=pltpu.CompilerParams(
            dimension_semantics=("parallel",),
            vmem_limit_bytes=vmem_limit,
        ),
        # NOTE: input_output_aliases={0: 0} (donating x) is possible when
        # x.dtype == out_dtype; omitted to keep the call side-effect free.
    )(x2, pe_l)

    return out2.reshape(L, B, D)


# ------------------------------ plain-JAX reference ------------------------- #

def reference_forward(x, pe):
    return x + pe[: x.shape[0]]


# ----------------------------------- main ----------------------------------- #

if __name__ == "__main__":
    key = jax.random.PRNGKey(0)
    kx, kp = jax.random.split(key)

    # x: [seq_len, batch, embed_dim]; pe: learnable (max_len, 1, d_model) ~ U(-0.02, 0.02).
    L, B, D = 8, 2, 128
    MAX_LEN = 32
    x = jax.random.normal(kx, (L, B, D), jnp.float32)
    pe = jax.random.uniform(kp, (MAX_LEN, 1, D), jnp.float32, -0.02, 0.02)

    ref = reference_forward(x, pe)

    # Force the Pallas path even at this tiny test shape.
    out = learnable_positional_encoding_forward(x, pe, min_pallas_bytes=0)
    out = jax.block_until_ready(out)
    assert out.shape == (L, B, D)
    if not bool(jnp.allclose(out, ref, atol=1e-6, rtol=1e-6)):
        raise SystemExit("Pallas kernel does not match reference")

    # Default path (tiny input -> fused plain-JAX add) must match as well.
    out_small = jax.block_until_ready(learnable_positional_encoding_forward(x, pe))
    if not bool(jnp.allclose(out_small, ref, atol=1e-6, rtol=1e-6)):
        raise SystemExit("small-input fast path does not match reference")

    print("KERNEL_OK")
</pallas_src>

<mosaic_0001>
module attributes {stable_mosaic.version = 11 : i64} {
  func.func @_pos_enc_kernel(%arg0: i32, %arg1: memref<8x256xf32, #tpu.memory_space<vmem>>, %arg2: memref<8x128xf32, #tpu.memory_space<vmem>>, %arg3: memref<8x256xf32, #tpu.memory_space<vmem>>) attributes {dimension_semantics = [#tpu.dimension_semantics<parallel>], iteration_bounds = array<i64: 1>, scalar_prefetch = 0 : i64, scratch_operands = 0 : i64, tpu.core_type = #tpu.core_type<tc>, window_params = [{transform_indices = @transform_0, window_bounds = array<i64: 8, 256>}, {transform_indices = @transform_1, window_bounds = array<i64: 8, 128>}, {transform_indices = @transform_2, window_bounds = array<i64: 8, 256>}]} {
    %c0 = arith.constant 0 : index
    %c0_0 = arith.constant 0 : index
    %0 = vector.load %arg2[%c0, %c0_0] : memref<8x128xf32, #tpu.memory_space<vmem>>, vector<8x128xf32>
    %1 = tpu.concatenate %0, %0 in 1 : vector<8x128xf32>, vector<8x128xf32> -> vector<8x256xf32>
    %c0_1 = arith.constant 0 : index
    %c0_2 = arith.constant 0 : index
    %2 = vector.load %arg1[%c0_1, %c0_2] : memref<8x256xf32, #tpu.memory_space<vmem>>, vector<8x256xf32>
    %3 = arith.addf %2, %1 : vector<8x256xf32>
    %c0_3 = arith.constant 0 : index
    %c0_4 = arith.constant 0 : index
    %4 = vector.load %arg3[%c0_3, %c0_4] : memref<8x256xf32, #tpu.memory_space<vmem>>, vector<8x256xf32>
    tpu.vector_store %arg3[%c0_3, %c0_4], %3 {strides = array<i32>} : memref<8x256xf32, #tpu.memory_space<vmem>>, vector<8x256xf32>,
    return
  }
  func.func @transform_0(%arg0: i32) -> (i32, i32) {
    %c0_i32 = arith.constant 0 : i32
    %c0_i32_0 = arith.constant 0 : i32
    return %arg0, %c0_i32 : i32, i32
  }
  func.func @transform_1(%arg0: i32) -> (i32, i32) {
    %c0_i32 = arith.constant 0 : i32
    %c0_i32_0 = arith.constant 0 : i32
    return %arg0, %c0_i32 : i32, i32
  }
  func.func @transform_2(%arg0: i32) -> (i32, i32) {
    %c0_i32 = arith.constant 0 : i32
    %c0_i32_0 = arith.constant 0 : i32
    return %arg0, %c0_i32 : i32, i32
  }
}

</mosaic_0001>

<bundles_post_ra>
// kernel: tpu_custom_call.1
= control target key start
LH: loop header
LB: loop body
LE: loop exit
PB: predicated region body
PF: predicated region fallthrough
CT: control target
= control target key end

     0   :  { %7 = vsyncpa [#allocation3], 0  ;;  %s188_s0 = inlined_call_operand.hbm [shape: f32[8,256], index: 0, kind: input, shape index: {}]   ;;  %s189_s1 = inlined_call_operand.hbm [shape: f32[8,128], index: 1, kind: input, shape index: {}]   ;;  %s190_s2 = inlined_call_operand.hbm [shape: f32[8,256], index: 2, kind: output, shape index: {}]  }
   0x1   :  { %8 = vsyncpa [#allocation6], 0 }
   0x2   :  { %9 = vsyncpa [#allocation4], 0  ;;  %s134_s9 = smov [#allocation2]   ;;  %s135_s11 = smov [#allocation5]  }
   0x3   :  { %s16_s10 = sshll.u32 %s134_s9, 4  ;;  %s26_s12 = sshll.u32 %s135_s11, 4  ;;  %s17_s10 = int_to_ptr.vmem [resolvable:$true] %s16_s10  ;;  %s27_s12 = int_to_ptr.vmem [resolvable:$true] %s26_s12 }
   0x4   :  { %s62_s15 = scalar_lea.hbm %s188_s0, 256 }
   0x5   :  { %p63_p0 = scmp.ne.s32.totalorder %s188_s0, %s62_s15  ;;  %p66_p1 = scmp.lt.u32.totalorder %s62_s15, %s188_s0 }
   0x7   :  { %p68_p2 = pnand %p66_p1, %p63_p0 }
   0x9   :  { %71 = shalt.err (!%p68_p2)
}
   0xa   :  { %s72_s20 = scalar_lea.vmem %s17_s10, 256  ;;  %p77_p4 = scmp.lt.s32.totalorder %s17_s10, %s17_s10 }
   0xb   :  { %p73_p3 = scmp.ne.s32.totalorder %s17_s10, %s72_s20  ;;  %p78_p5 = scmp.lt.s32.totalorder %s72_s20, %s72_s20 }
   0xd   :  { %p79_p6 = por %p78_p5, %p77_p4 }
   0xf   :  { %p80_p7 = pnand %p79_p6, %p73_p3 }
  0x11   :  { %83 = shalt.err (!%p80_p7)
}
  0x12   :  { %19 = dma.hbm_to_vmem [thread:$0]  %s188_s0, 256, %s17_s10, [#allocation3]  }
  0x13   :  { %s84_s25 = scalar_lea.hbm %s189_s1, 128 }
  0x14   :  { %p85_p8 = scmp.ne.s32.totalorder %s189_s1, %s84_s25  ;;  %p88_p9 = scmp.lt.u32.totalorder %s84_s25, %s189_s1 }
  0x16   :  { %p90_p10 = pnand %p88_p9, %p85_p8 }
  0x18   :  { %93 = shalt.err (!%p90_p10)
}
  0x19   :  { %s94_s30 = scalar_lea.vmem %s27_s12, 128  ;;  %p99_p12 = scmp.lt.s32.totalorder %s27_s12, %s27_s12 }
  0x1a   :  { %p95_p11 = scmp.ne.s32.totalorder %s27_s12, %s94_s30  ;;  %p100_p13 = scmp.lt.s32.totalorder %s94_s30, %s94_s30 }
  0x1c   :  { %p101_p0 = por %p100_p13, %p99_p12 }
  0x1e   :  { %p102_p1 = pnand %p101_p0, %p95_p11 }
  0x20   :  { %105 = shalt.err (!%p102_p1)
}
  0x21   :  { %29 = dma.hbm_to_vmem [thread:$0]  %s189_s1, 128, %s27_s12, [#allocation6]  }
  0x22   :  { %128 = dma.done.wait [#allocation3], 256  }
  0x23   :  { %129 = vsyncadd [#allocation3], 4294967040 }
  0x24   :  { %130 = dma.done.wait [#allocation6], 128  }
  0x25   :  { %131 = vsyncadd [#allocation6], 4294967168  ;;  %s136_s4 = smov [#allocation7]   ;;  %v36_v0 = vld [vmem:[#allocation5] sm:$0xff]  ;;  %v37_v1 = vld [vmem:[#allocation2] sm:$0xff] }
  0x26   :  { %s49_s5 = sshll.u32 %s136_s4, 4  ;;  %v38_v2 = vld [vmem:[#allocation2 + $0x8] sm:$0xff]  ;;  %v39_v3 = vadd.f32 %v37_v1, %v36_v0  ;;  %s50_s5 = int_to_ptr.vmem [resolvable:$true] %s49_s5 }
  0x27   :  { %v40_v4 = vadd.f32 %v38_v2, %v36_v0  ;;  %s106_s6 = scalar_lea.vmem %s50_s5, 256  ;;  %p111_p3 = scmp.lt.s32.totalorder %s50_s5, %s50_s5 }
  0x28   :  { %41 = vst [vmem:[#allocation7] sm:$0xff] %v39_v3  ;;  %p107_p2 = scmp.ne.s32.totalorder %s50_s5, %s106_s6  ;;  %p112_p4 = scmp.lt.s32.totalorder %s106_s6, %s106_s6 }
  0x29   :  { %42 = vst [vmem:[#allocation7 + $0x8] sm:$0xff] %v40_v4 }
  0x2a   :  { %p113_p5 = por %p112_p4, %p111_p3 }
  0x2c   :  { %p114_p6 = pnand %p113_p5, %p107_p2 }
  0x2e   :  { %117 = shalt.err (!%p114_p6)
}
  0x2f   :  { %s118_s8 = scalar_lea.hbm %s190_s2, 256 }
  0x30   :  { %p119_p7 = scmp.ne.s32.totalorder %s190_s2, %s118_s8  ;;  %p122_p8 = scmp.lt.u32.totalorder %s118_s8, %s190_s2 }
  0x32   :  { %p124_p9 = pnand %p122_p8, %p119_p7 }
  0x34   :  { %127 = shalt.err (!%p124_p9)
}
  0x35   :  { %52 = dma.vmem_to_hbm [thread:$0]  %s50_s5, 256, %s190_s2, [#allocation4]  }
  0x36   :  { %132 = dma.done.wait [#allocation4], 256  }
  0x37   :  { %133 = vsyncadd [#allocation4], 4294967040 }
  0x38   :  { %56 = vsyncpa [#allocation3], 1 }
  0x39   :  { %57 = vsyncpa [#allocation6], 1 }
  0x3a   :  { %58 = vsyncpa [#allocation4], 1 }

</bundles_post_ra>
